<compile_context>
chip_gen: v7x
topology: tpu7x:2x2x1
jax: 0.10.0
libtpu: 0.0.40
codegen_flags: <defaults>
</compile_context>

<pallas_src>
import functools

import jax
import jax.numpy as jnp
from jax.experimental import pallas as pl
from jax.experimental.pallas import tpu as pltpu


_LANE = 128
_SUBLANE = 8
_BLOCK_BYTES_BUDGET = 6 * 1024 * 1024   # target per-grid-step block footprint


def _round_up(v, m):
    return ((v + m - 1) // m) * m


def _chebnet_kernel(x_ref, adj_ref, w_ref, out_ref, *, K):
    """One grid step: `bb` whole graphs.

    x_ref:   (bb, Np, Cin_p)      float32
    adj_ref: (bb, Np, Np)         bfloat16
    w_ref:   (K*Cin_p, Cout_p)    bfloat16  (filters fused over K)
    out_ref: (bb, Np, Cout_p)     float32
    """
    x = x_ref[...]                       # f32 recursion state Tx_0
    adj = adj_ref[...]                   # bf16 MXU input

    bases = [x]
    if K > 1:
        # Tx_1 = adj @ x  (bf16 MXU inputs, f32 accumulation / state)
        tx_prev = x
        tx_cur = jnp.einsum(
            "bij,bjc->bic", adj, x.astype(jnp.bfloat16),
            preferred_element_type=jnp.float32)
        bases.append(tx_cur)
        # Tx_k = 2*adj@Tx_{k-1} - Tx_{k-2}; K is a static Python int -> unrolled.
        for _ in range(2, K):
            tx_next = 2.0 * jnp.einsum(
                "bij,bjc->bic", adj, tx_cur.astype(jnp.bfloat16),
                preferred_element_type=jnp.float32) - tx_prev
            bases.append(tx_next)
            tx_prev, tx_cur = tx_cur, tx_next

    # Fused projection: concat the K Chebyshev bases along the (lane-aligned,
    # 128-multiple) channel axis and hit the MXU once instead of K times.
    basis = jnp.concatenate(bases, axis=-1)          # (bb, Np, K*Cin_p) f32
    bb, np_, kc = basis.shape
    cout_p = out_ref.shape[-1]
    proj = jnp.dot(
        basis.reshape(bb * np_, kc).astype(jnp.bfloat16),
        w_ref[...],
        preferred_element_type=jnp.float32)          # (bb*Np, Cout_p) f32
    out_ref[...] = proj.reshape(bb, np_, cout_p).astype(out_ref.dtype)


def chebnet_forward(x, adj, filters):
    """ChebNet forward.  x: (B, N, Cin), adj: (B, N, N), filters: (K, Cin, Cout)."""
    B, N, Cin = x.shape
    K, _, Cout = filters.shape

    # Lane/sublane-friendly padded sizes.
    Np = _round_up(N, _SUBLANE)
    Cin_p = _round_up(Cin, _LANE)
    Cout_p = _round_up(Cout, _LANE)

    # How many graphs per grid step: fill a ~6 MiB block, but keep >= 2 grid
    # steps when B >= 2 so both v7x TensorCores get work (v5e/v6e have 1 TC).
    per_graph_bytes = (Np * Np * 2          # adj (bf16)
                       + Np * Cin_p * 4     # x   (f32)
                       + Np * Cout_p * 4)   # out (f32)
    bb = max(1, min(_BLOCK_BYTES_BUDGET // per_graph_bytes, pl.cdiv(B, 2)))
    num_blocks = pl.cdiv(B, bb)
    Bp = num_blocks * bb

    # Zero padding never changes the real outputs (padded adj rows/cols, x
    # channels, filter rows/cols and batch entries are all zero).
    x_p = jnp.pad(x.astype(jnp.float32),
                  ((0, Bp - B), (0, Np - N), (0, Cin_p - Cin)))
    adj_p = jnp.pad(adj, ((0, Bp - B), (0, Np - N), (0, Np - N))
                    ).astype(jnp.bfloat16)
    w_p = jnp.pad(filters, ((0, 0), (0, Cin_p - Cin), (0, Cout_p - Cout))
                  ).reshape(K * Cin_p, Cout_p).astype(jnp.bfloat16)

    # Explicit scoped-VMEM budget: enough for double-buffered blocks + the
    # resident weights/basis, clamped below v7x's 64 MiB physical VMEM.
    block_bytes = bb * per_graph_bytes
    w_bytes = K * Cin_p * Cout_p * 2
    basis_bytes = bb * Np * K * Cin_p * 4
    need = 2 * block_bytes + 2 * w_bytes + 2 * basis_bytes + (2 << 20)
    vmem_limit = int(min(max(need, 32 << 20), 48 << 20))

    kernel = functools.partial(_chebnet_kernel, K=K)

    out_p = pl.pallas_call(
        kernel,
        out_shape=jax.ShapeDtypeStruct((Bp, Np, Cout_p), jnp.float32),
        grid_spec=pltpu.PrefetchScalarGridSpec(
            num_scalar_prefetch=0,
            grid=(num_blocks,),
            in_specs=[
                pl.BlockSpec((bb, Np, Cin_p), lambda b: (b, 0, 0)),
                pl.BlockSpec((bb, Np, Np), lambda b: (b, 0, 0)),
                pl.BlockSpec((K * Cin_p, Cout_p), lambda b: (0, 0)),
            ],
            out_specs=pl.BlockSpec((bb, Np, Cout_p), lambda b: (b, 0, 0)),
        ),
        compiler_params=pltpu.CompilerParams(
            dimension_semantics=("parallel",),
            vmem_limit_bytes=vmem_limit),
    )(x_p, adj_p, w_p)

    return out_p[:B, :N, :Cout].astype(x.dtype)


def _xavier_uniform(key, shape):
    # Matches torch.nn.init.xavier_uniform_ fans for a (K, Cin, Cout) tensor:
    #   fan_in = Cin * Cout, fan_out = K * Cout
    K, cin, cout = shape
    fan_in = cin * cout
    fan_out = K * cout
    bound = jnp.sqrt(6.0 / (fan_in + fan_out))
    return jax.random.uniform(key, shape, jnp.float32, -bound, bound)


def _chebnet_reference_f32(x, adj, filters):
    """Pure-f32 reference (mirrors the PyTorch forward)."""
    K = filters.shape[0]
    tx0 = x
    out = jnp.einsum("bnc,co->bno", tx0, filters[0])
    if K > 1:
        tx1 = jnp.einsum("bnm,bmc->bnc", adj, x)
        out = out + jnp.einsum("bnc,co->bno", tx1, filters[1])
        for k in range(2, K):
            tx2 = 2.0 * jnp.einsum("bnm,bmc->bnc", adj, tx1) - tx0
            out = out + jnp.einsum("bnc,co->bno", tx2, filters[k])
            tx0, tx1 = tx1, tx2
    return out


def _chebnet_reference_mixed(x, adj, filters):
    """Emulates the kernel's mixed precision (bf16 MXU inputs, f32 state)."""
    K = filters.shape[0]
    adj16 = adj.astype(jnp.bfloat16)
    w16 = filters.astype(jnp.bfloat16)
    tx0 = x.astype(jnp.float32)
    bases = [tx0]
    if K > 1:
        tx1 = jnp.einsum("bnm,bmc->bnc", adj16, tx0.astype(jnp.bfloat16),
                         preferred_element_type=jnp.float32)
        bases.append(tx1)
        for _ in range(2, K):
            tx2 = 2.0 * jnp.einsum("bnm,bmc->bnc", adj16,
                                   tx1.astype(jnp.bfloat16),
                                   preferred_element_type=jnp.float32) - tx0
            bases.append(tx2)
            tx0, tx1 = tx1, tx2
    out = jnp.zeros(x.shape[:2] + (filters.shape[-1],), jnp.float32)
    for k in range(K):
        out = out + jnp.einsum("bnc,co->bno", bases[k].astype(jnp.bfloat16),
                               w16[k], preferred_element_type=jnp.float32)
    return out


if __name__ == "__main__":
    key = jax.random.PRNGKey(0)
    k_x, k_adj, k_w = jax.random.split(key, 3)

    B, N, Cin, Cout, K = 2, 16, 4, 8, 3

    x = jax.random.normal(k_x, (B, N, Cin), jnp.float32)
    adj = jax.random.normal(k_adj, (B, N, N), jnp.float32)
    filters = _xavier_uniform(k_w, (K, Cin, Cout))

    out = chebnet_forward(x, adj, filters)
    out = jax.block_until_ready(out)
    assert out.shape == (B, N, Cout)

    ref_mixed = _chebnet_reference_mixed(x, adj, filters)
    ref_f32 = _chebnet_reference_f32(x, adj, filters)
    scale = float(jnp.max(jnp.abs(ref_f32))) + 1e-6

    # Strict check vs. a reference using the same mixed precision as the kernel.
    assert float(jnp.max(jnp.abs(out - ref_mixed))) <= 2e-2 * scale
    # Looser sanity check vs. pure-f32 math (bf16 MXU inputs cost ~0.4% rel).
    assert float(jnp.max(jnp.abs(out - ref_f32))) <= 1e-1 * scale

    print("KERNEL_OK")
</pallas_src>

<mosaic_0001>
module attributes {stable_mosaic.version = 11 : i64} {
  func.func @_chebnet_kernel(%arg0: i32, %arg1: memref<1x16x128xf32, #tpu.memory_space<vmem>>, %arg2: memref<1x16x16xbf16, #tpu.memory_space<vmem>>, %arg3: memref<384x128xbf16, #tpu.memory_space<vmem>>, %arg4: memref<1x16x128xf32, #tpu.memory_space<vmem>>) attributes {dimension_semantics = [#tpu.dimension_semantics<parallel>], iteration_bounds = array<i64: 2>, scalar_prefetch = 0 : i64, scratch_operands = 0 : i64, tpu.core_type = #tpu.core_type<tc>, window_params = [{transform_indices = @transform_0, window_bounds = array<i64: 1, 16, 128>}, {transform_indices = @transform_1, window_bounds = array<i64: 1, 16, 16>}, {pipeline_mode = #tpu.pipeline_mode<synchronous>, transform_indices = @transform_2, window_bounds = array<i64: 384, 128>}, {transform_indices = @transform_3, window_bounds = array<i64: 1, 16, 128>}]} {
    %c0 = arith.constant 0 : index
    %c0_0 = arith.constant 0 : index
    %c0_1 = arith.constant 0 : index
    %0 = vector.load %arg1[%c0, %c0_0, %c0_1] : memref<1x16x128xf32, #tpu.memory_space<vmem>>, vector<1x16x128xf32>
    %c0_2 = arith.constant 0 : index
    %c0_3 = arith.constant 0 : index
    %c0_4 = arith.constant 0 : index
    %1 = vector.load %arg2[%c0_2, %c0_3, %c0_4] : memref<1x16x16xbf16, #tpu.memory_space<vmem>>, vector<1x16x16xbf16>
    %2 = arith.truncf %0 : vector<1x16x128xf32> to vector<1x16x128xbf16>
    "tpu.trace_start"() <{level = 10 : i32, message = "bij,bjc->bic"}> : () -> ()
    %cst = arith.constant dense<0.000000e+00> : vector<1x16x128xf32>
    %3 = tpu.matmul %1, %2, %cst {dimension_numbers = #tpu.dot_dimension_numbers<[2], [1], [1], [2], [0, 0, 0, 1, 1, 2], [0], [0]>} : vector<1x16x16xbf16>, vector<1x16x128xbf16>, vector<1x16x128xf32> -> vector<1x16x128xf32>
    "tpu.trace_stop"() : () -> ()
    %4 = arith.truncf %3 : vector<1x16x128xf32> to vector<1x16x128xbf16>
    "tpu.trace_start"() <{level = 10 : i32, message = "bij,bjc->bic"}> : () -> ()
    %cst_5 = arith.constant dense<0.000000e+00> : vector<1x16x128xf32>
    %5 = tpu.matmul %1, %4, %cst_5 {dimension_numbers = #tpu.dot_dimension_numbers<[2], [1], [1], [2], [0, 0, 0, 1, 1, 2], [0], [0]>} : vector<1x16x16xbf16>, vector<1x16x128xbf16>, vector<1x16x128xf32> -> vector<1x16x128xf32>
    "tpu.trace_stop"() : () -> ()
    %cst_6 = arith.constant 2.000000e+00 : f32
    %6 = vector.broadcast %cst_6 : f32 to vector<1x16x128xf32>
    %7 = arith.mulf %6, %5 : vector<1x16x128xf32>
    %8 = arith.subf %7, %0 : vector<1x16x128xf32>
    %9 = tpu.concatenate %0, %3, %8 in 2 : vector<1x16x128xf32>, vector<1x16x128xf32>, vector<1x16x128xf32> -> vector<1x16x384xf32>
    %10 = vector.shape_cast %9 : vector<1x16x384xf32> to vector<16x384xf32>
    %11 = arith.truncf %10 : vector<16x384xf32> to vector<16x384xbf16>
    %c0_7 = arith.constant 0 : index
    %c0_8 = arith.constant 0 : index
    %12 = vector.load %arg3[%c0_7, %c0_8] : memref<384x128xbf16, #tpu.memory_space<vmem>>, vector<384x128xbf16>
    %cst_9 = arith.constant dense<0.000000e+00> : vector<16x128xf32>
    %13 = tpu.matmul %11, %12, %cst_9 {dimension_numbers = #tpu.dot_dimension_numbers<[1], [0], [0], [1], [0, 0, 1, 1], [], []>} : vector<16x384xbf16>, vector<384x128xbf16>, vector<16x128xf32> -> vector<16x128xf32>
    %14 = vector.shape_cast %13 : vector<16x128xf32> to vector<1x16x128xf32>
    %c0_10 = arith.constant 0 : index
    %c0_11 = arith.constant 0 : index
    %c0_12 = arith.constant 0 : index
    %15 = vector.load %arg4[%c0_10, %c0_11, %c0_12] : memref<1x16x128xf32, #tpu.memory_space<vmem>>, vector<1x16x128xf32>
    tpu.vector_store %arg4[%c0_10, %c0_11, %c0_12], %14 {strides = array<i32>} : memref<1x16x128xf32, #tpu.memory_space<vmem>>, vector<1x16x128xf32>,
    return
  }
  func.func @transform_0(%arg0: i32) -> (i32, i32, i32) {
    %c0_i32 = arith.constant 0 : i32
    %c0_i32_0 = arith.constant 0 : i32
    %c0_i32_1 = arith.constant 0 : i32
    return %arg0, %c0_i32, %c0_i32_0 : i32, i32, i32
  }
  func.func @transform_1(%arg0: i32) -> (i32, i32, i32) {
    %c0_i32 = arith.constant 0 : i32
    %c0_i32_0 = arith.constant 0 : i32
    %c0_i32_1 = arith.constant 0 : i32
    return %arg0, %c0_i32, %c0_i32_0 : i32, i32, i32
  }
  func.func @transform_2(%arg0: i32) -> (i32, i32) {
    %c0_i32 = arith.constant 0 : i32
    %c0_i32_0 = arith.constant 0 : i32
    %c0_i32_1 = arith.constant 0 : i32
    return %c0_i32, %c0_i32_0 : i32, i32
  }
  func.func @transform_3(%arg0: i32) -> (i32, i32, i32) {
    %c0_i32 = arith.constant 0 : i32
    %c0_i32_0 = arith.constant 0 : i32
    %c0_i32_1 = arith.constant 0 : i32
    return %arg0, %c0_i32, %c0_i32_0 : i32, i32, i32
  }
}

</mosaic_0001>

<bundles_post_ra>
// kernel: tpu_custom_call.1
= control target key start
LH: loop header
LB: loop body
LE: loop exit
PB: predicated region body
PF: predicated region fallthrough
CT: control target
= control target key end

     0   :  { %s1435_s0 = inlined_call_operand.hbm [shape: f32[2,16,128], index: 0, kind: input, shape index: {}]   ;;  %s1436_s1 = inlined_call_operand.hbm [shape: bf16[2,16,16], index: 1, kind: input, shape index: {}]   ;;  %s1437_s2 = inlined_call_operand.hbm [shape: bf16[384,128], index: 2, kind: input, shape index: {}]   ;;  %s1438_s3 = inlined_call_operand.hbm [shape: f32[2,16,128], index: 3, kind: output, shape index: {}]  }
   0x1   :  { %1444 = sst [smem:[#allocation13_spill]] %s1435_s0 }
   0x2   :  { %8 = vsyncpa [#allocation3], 0 }
   0x3   :  { %10 = vsyncpa [#allocation3 + $0x1], 0 }
   0x4   :  { %11 = vsyncpa [#allocation6], 0 }
   0x5   :  { %13 = vsyncpa [#allocation6 + $0x1], 0 }
   0x6   :  { %14 = vsyncpa [#allocation4], 0 }
   0x7   :  { %16 = vsyncpa [#allocation4 + $0x1], 0  ;;  %s1149_s12 = smov 0   ;;  %s1151_s13 = smov 0  }
   0x8   :  { %s1153_s14 = smov 0   ;;  %s1155_s15 = smov 0  }
   0x9 LB: > { %s1170_s16 = sadd.s32 4294967295, %s1115_s15   ;;  %s741_s17 = sadd.s32 4294967294, %s1115_s15   ;;  %s1115_s15 = sphi %s1155_s15, %s1464_s15   ;;  %s1111_s14 = sphi %s1153_s14, %s1463_s14   ;;  %s1107_s13 = sphi %s1151_s13, %s1462_s13   ;;  %s1103_s12 = sphi %s1149_s12, %s1461_s12  }
   0xa   : > { %p42_p0 = scmp.ne.s32.totalorder %s1107_s13, %s1103_s12  ;;  %p1439_p1 = scmp.eq.s32.totalorder %s1170_s16, 0 }
   0xb   : > { %p119_p3 = scmp.eq.s32.totalorder %s741_s17, 1  ;;  %p742_p5 = scmp.ge.s32.totalorder %s1115_s15, 1 }
   0xc   : > { %p1179_p4 = por %p1439_p1, %p42_p0  ;;  %p126_p7 = scmp.lt.s32.totalorder %s1115_s15, 3 }
   0xd   : > { %p1184_p6 = por %p119_p3, %p42_p0  ;;  %s1117_s21 = smov [#allocation7]  }
   0xe   : > { %s1445_s18 = scalar_select %p1179_p4, 1, 0 }
   0xf   : > { %s1446_s19 = scalar_select %p1184_p6, 1, 0 }
  0x10   : > { %p1189_p8 = pnand %p742_p5, %p126_p7  ;;  %s138_s22 = sshll.u32 %s1117_s21, 4  ;;  %s1193_s22 = int_to_ptr.vmem [resolvable:$true] %s138_s22 }
  0x11   : > { %s1205_s24 = sadd.s32 1, %s1115_s15   ;;  %s29_s25 = sadd.s32 1, %s1111_s14 }
  0x12   : > { %s1447_s20 = scalar_select %p1189_p8, 1, 0 }
  0x13   : > { %p868_p9 = pneg %p1189_p8  ;;  %s26_s26 = ssub.s32 %s1115_s15, %s1205_s24 }
  0x14   : > { %s953_s29 = scalar_lea.hbm %s1437_s2, 3072 }
  0x15   : > { %p1200_p11 = pnand %p868_p9, %p1439_p1  ;;  %p954_p12 = scmp.ne.s32.totalorder %s1437_s2, %s953_s29 }
  0x16   : > { %p960_p5 = scmp.lt.u32.totalorder %s953_s29, %s1437_s2 }
  0x17   : > { %p955_p13 = pneg %p1200_p11 }
  0x19   : > { %p956_p0 = pnand %p955_p13, %p954_p12 }
  0x1b   : > { %p957_p3 = pneg %p956_p0 }
  0x1d   : > { %p962_p7 = pnand %p960_p5, %p957_p3 }
  0x1f   : > { %965 = shalt.err (!%p962_p7)
}
  0x20   : > { %s966_s7 = scalar_lea.vmem %s1193_s22, 3072  ;;  %p974_p2 = scmp.lt.s32.totalorder %s1193_s22, %s1193_s22 }
  0x21   : > { %p967_p9 = scmp.ne.s32.totalorder %s1193_s22, %s966_s7  ;;  %p975_p6 = scmp.lt.s32.totalorder %s966_s7, %s966_s7 }
  0x23   : > { %p969_p10 = pnand %p967_p9, %p955_p13  ;;  %p976_p4 = por %p975_p6, %p974_p2 }
  0x25   : > { %p970_p1 = pneg %p969_p10 }
  0x27   : > { %p977_p8 = pnand %p976_p4, %p970_p1 }
  0x29   : > { %980 = shalt.err (!%p977_p8)
}
  0x2a   : > { %s1442_s8 = smov 64   ;;  %s1443_s9 = smov 4  }
  0x2b   : > { %871 = dma.hbm_to_vmem [thread:$0]  (!%p1200_p11), %s1437_s2, 3072, %s1193_s22, [#allocation6], %s1442_s8, %s1442_s8, %s1443_s9  }
  0x2c   : > { %p27_p1 = scmp.eq.s32.totalorder %s26_s26, 0  ;;  %p36_p2 = scmp.ne.s32.totalorder %s1111_s14, %s1107_s13 }
  0x2d   : > { %p37_p4 = scmp.eq.s32.totalorder %s1115_s15, 0  ;;  %p884_p6 = scmp.lt.s32.totalorder %s1115_s15, 2 }
  0x2e   : > { %s1239_s17 = scalar_select %p27_p1, %s1111_s14, %s29_s25  }
  0x2f   : > { %p38_p8 = por %p37_p4, %p36_p2  ;;  %p1449_p10 = scmp.eq.s32.totalorder %s1170_s16, 1 }
  0x30   : > { %s1248_s23 = sand.u32 1, %s1111_s14   ;;  %s788_s27 = sshll.u32 %s1115_s15, 8 }
  0x31   : > { %p1243_p12 = por %p1449_p10, %p36_p2  ;;  %s745_s28 = sshll.u32 %s1248_s23, 4 }
  0x32   : > { %s1451_s0 = sld [smem:[#allocation13_spill]]  ;;  %s156_s25 = scalar_lea.vmem [#allocation2], %s745_s28 }
  0x33   : > { %s163_s30 = sshll.u32 %s156_s25, 4  ;;  %p1257_p11 = pnand %p884_p6, %p38_p8  ;;  %s1261_s30 = int_to_ptr.vmem [resolvable:$true] %s163_s30 }
  0x34   : > { %s153_s5 = scalar_lea.sflag [#allocation3], %s1248_s23 }
  0x35   : > { %p983_p0 = pneg %p1257_p11 }
  0x38   : > { %s1255_s26 = scalar_lea.hbm %s1451_s0, %s788_s27  ;;  %s986_s11 = scalar_lea.hbm %s1451_s0, 512 }
  0x39   : > { %s981_s6 = scalar_lea.hbm %s1255_s26, 256  ;;  %p987_p7 = scmp.lt.u32.totalorder %s1255_s26, %s1451_s0 }
  0x3a   : > { %p982_p13 = scmp.ne.s32.totalorder %s1255_s26, %s981_s6  ;;  %p988_p9 = scmp.lt.u32.totalorder %s986_s11, %s981_s6 }
  0x3b   : > { %p990_p2 = scmp.lt.u32.totalorder %s981_s6, %s1255_s26 }
  0x3c   : > { %p984_p3 = pnand %p983_p0, %p982_p13  ;;  %p989_p1 = por %p988_p9, %p987_p7 }
  0x3e   : > { %p985_p5 = pneg %p984_p3  ;;  %p991_p4 = por %p990_p2, %p989_p1 }
  0x40   : > { %p992_p6 = pnand %p991_p4, %p985_p5 }
  0x42   : > { %995 = shalt.err (!%p992_p6)
}
  0x43   : > { %s996_s29 = scalar_lea.vmem %s1261_s30, 256  ;;  %s1120_s22 = smov [#allocation2]  }
  0x44   : > { %p997_p8 = scmp.ne.s32.totalorder %s1261_s30, %s996_s29  ;;  %s1001_s25 = sshll.u32 %s1120_s22, 4  ;;  %s1002_s25 = int_to_ptr.vmem [resolvable:$false] %s1001_s25 }
  0x45   : > { %s1003_s7 = scalar_lea.vmem %s1002_s25, 512  ;;  %p1004_p3 = scmp.lt.s32.totalorder %s1261_s30, %s1002_s25 }
  0x46   : > { %p999_p10 = pnand %p997_p8, %p983_p0  ;;  %p1005_p7 = scmp.lt.s32.totalorder %s1003_s7, %s996_s29 }
  0x48   : > { %p1000_p13 = pneg %p999_p10  ;;  %p1006_p9 = por %p1005_p7, %p1004_p3 }
  0x4a   : > { %p1007_p1 = pnand %p1006_p9, %p1000_p13 }
  0x4c   : > { %1010 = shalt.err (!%p1007_p1)
}
  0x4d   : > { %s1121_s6 = smov 128   ;;  %s1122_s10 = smov 8  }
  0x4e   : > { %875 = dma.hbm_to_vmem [thread:$0]  (!%p1257_p11), %s1255_s26, 256, %s1261_s30, %s153_s5, %s1121_s6, %s1121_s6, %s1122_s10  }
  0x4f   : > { %s173_s11 = sand.u32 1, %s1115_s15   ;;  %s748_s27 = sshll.u32 %s1248_s23, 3 }
  0x50   : > { %s789_s28 = sshll.u32 %s1115_s15, 7  ;;  %s177_s29 = scalar_lea.vmem [#allocation5], %s748_s27 }
  0x51   : > { %s184_s22 = sshll.u32 %s177_s29, 4  ;;  %s1297_s8 = scalar_lea.hbm %s1436_s1, %s789_s28  ;;  %s1299_s22 = int_to_ptr.vmem [resolvable:$true] %s184_s22 }
  0x52   : > { %s1301_s9 = scalar_lea.sflag [#allocation6], %s173_s11  ;;  %s1011_s0 = scalar_lea.hbm %s1297_s8, 128 }
  0x53   : > { %p1012_p5 = scmp.ne.s32.totalorder %s1297_s8, %s1011_s0  ;;  %s1016_s30 = scalar_lea.hbm %s1436_s1, 256 }
  0x54   : > { %p1017_p6 = scmp.lt.u32.totalorder %s1297_s8, %s1436_s1  ;;  %p1018_p8 = scmp.lt.u32.totalorder %s1016_s30, %s1011_s0 }
  0x55   : > { %p1014_p2 = pnand %p1012_p5, %p983_p0  ;;  %p1020_p13 = scmp.lt.u32.totalorder %s1011_s0, %s1297_s8 }
  0x56   : > { %p1019_p10 = por %p1018_p8, %p1017_p6 }
  0x57   : > { %p1015_p4 = pneg %p1014_p2 }
  0x58   : > { %p1021_p3 = por %p1020_p13, %p1019_p10 }
  0x5a   : > { %p1022_p7 = pnand %p1021_p3, %p1015_p4 }
  0x5c   : > { %1025 = shalt.err (!%p1022_p7)
}
  0x5d   : > { %s1026_s10 = scalar_lea.vmem %s1299_s22, 128  ;;  %s1123_s11 = smov [#allocation5]  }
  0x5e   : > { %p1027_p9 = scmp.ne.s32.totalorder %s1299_s22, %s1026_s10  ;;  %s1031_s27 = sshll.u32 %s1123_s11, 4  ;;  %s1032_s27 = int_to_ptr.vmem [resolvable:$false] %s1031_s27 }
  0x5f   : > { %s1033_s28 = scalar_lea.vmem %s1032_s27, 256  ;;  %p1034_p2 = scmp.lt.s32.totalorder %s1299_s22, %s1032_s27 }
  0x60   : > { %p1029_p1 = pnand %p1027_p9, %p983_p0  ;;  %p1035_p6 = scmp.lt.s32.totalorder %s1033_s28, %s1026_s10 }
  0x62   : > { %p1030_p5 = pneg %p1029_p1  ;;  %p1036_p8 = por %p1035_p6, %p1034_p2 }
  0x64   : > { %p1037_p10 = pnand %p1036_p8, %p1030_p5 }
  0x66   : > { %1040 = shalt.err (!%p1037_p10)
}
  0x67   : > { %s1453_s0 = smov 4   ;;  %s1454_s29 = smov 64  }
  0x68   : > { %878 = dma.hbm_to_vmem [thread:$0]  (!%p1257_p11), %s1297_s8, 128, %s1299_s22, %s1301_s9, %s1454_s29, %s1454_s29, %s1453_s0  }
  0x69   : > { %p1455_p0 = scmp.ne.s32.totalorder %s1447_s20, 0 }
  0x6a   : > { %s1333_s25 = sand.u32 (!%p1455_p0), 1, %s1107_s13   ;;  %p1456_p4 = scmp.ne.s32.totalorder (!%p1455_p0), %s1445_s18, 0 }
  0x6b   : > { %196 = sbr.rel (%p1455_p0) target bundleno = 797 (0x31d), region = 32  ;;  %s752_s7 = sshll.u32 (!%p1455_p0), %s1333_s25, 4 }
  0x6c   : > { %s199_s23 = scalar_lea.sflag (!%p1455_p0), [#allocation3], %s1333_s25  ;;  %s202_s4 = scalar_lea.vmem (!%p1455_p0), [#allocation2], %s752_s7 }
  0x72   : > { %1086 = dma.done.wait (%p1456_p4), %s199_s23, 256  }
  0x73   : > { %1088 = vsyncadd (%p1456_p4), %s199_s23, 4294967040  ;;  %s207_s20 = sand.u32 1, %s1170_s16   ;;  %s753_s8 = sshll.u32 %s1333_s25, 3 }
  0x74   : > { %s208_s9 = scalar_lea.sflag [#allocation6], %s207_s20  ;;  %s211_s22 = scalar_lea.vmem [#allocation5], %s753_s8 }
  0x75   : > { %1090 = dma.done.wait (%p1456_p4), %s208_s9, 128  }
  0x76   : > { %1092 = vsyncadd (%p1456_p4), %s208_s9, 4294967168  ;;  %p1457_p11 = scmp.eq.s32.totalorder %s1170_s16, 0 }
  0x78   : > { %1094 = dma.done.wait (%p1457_p11), [#allocation6], 3072   ;;  %p1458_p13 = pmov %p1457_p11 }
  0x79   : > { %v1124_v0 = vmov 0.0   ;;  %vm1125_vm0 = vmmov 0   ;;  %v1359_v1 = vld [vmem:[%s202_s4] sm:$0xff]  ;;  %v1361_v2 = vld [vmem:[%s202_s4 + $0x8] sm:$0xff]  ;;  %vm254_vm1 = vcmask 130048   ;;  %s242_s18 = scalar_lea.vmem [#allocation8], %s752_s7 }
  0x7a   : > { %1096 = vsyncadd (%p1458_p13), [#allocation6], 4294964224  ;;  %826 = vmatprep.subr.bf16.mxu0 %v1124_v0  ;;  %828 = vmatprep.mubr.msk.bf16.mxu0 %vm1125_vm0, %v1124_v0  ;;  %v1365_v3 = vpack.c.bf16 %v1361_v2, %v1359_v1  ;;  %v928_v4 = vld [vmem:[%s211_s22] sm:$0xff]   ;;  %v929_v5 = vld [vmem:[#allocation7 + $0x40] sm:$0xff]   ;;  %s636_s26 = sshll.u32 %s242_s18, 4  ;;  %s790_s30 = sshll.u32 %s1170_s16, 8  ;;  %s1386_s26 = int_to_ptr.vmem [resolvable:$true] %s636_s26 }
  0x7b   : > { %832 = vmatprep.subr.bf16.mxu1 %v1124_v0  ;;  %834 = vmatprep.mubr.msk.bf16.mxu1 %vm1125_vm0, %v1124_v0  ;;  %v930_v6 = vld [vmem:[#allocation7] sm:$0xff]   ;;  %v931_v7 = vld [vmem:[#allocation7 + $0x48] sm:$0xff]   ;;  %v934_v9 = vld [vmem:[#allocation7 + $0x50] sm:$0xff]   ;;  %s1391_s10 = scalar_lea.hbm %s1438_s3, %s790_s30  ;;  %s623_s11 = scalar_lea.sflag [#allocation4], %s1333_s25 }
  0x7c   : > { %827 = vmatpush3.bf16.msra.mxu0 %v1365_v3  ;;  %v932_v8 = vld [vmem:[#allocation7 + $0x8] sm:$0xff]   ;;  %v935_v10 = vld [vmem:[#allocation7 + $0x10] sm:$0xff]   ;;  %v937_v11 = vld [vmem:[#allocation7 + $0x58] sm:$0xff]   ;;  %s1041_s16 = scalar_lea.vmem %s1386_s26, 256  ;;  %s1126_s27 = smov [#allocation8]  }
  0x7d   : > { %795 = vmatprep.subr.bf16.mxu0 %v929_v5  ;;  %v938_v12 = vld [vmem:[#allocation7 + $0x18] sm:$0xff]   ;;  %v940_v13 = vld [vmem:[#allocation7 + $0x60] sm:$0xff]   ;;  %v943_v15 = vld [vmem:[#allocation7 + $0x68] sm:$0xff]   ;;  %p1042_p3 = scmp.ne.s32.totalorder %s1386_s26, %s1041_s16  ;;  %s1045_s28 = sshll.u32 %s1126_s27, 4  ;;  %s1046_s28 = int_to_ptr.vmem [resolvable:$false] %s1045_s28 }
  0x7e   : > { %v941_v14 = vld [vmem:[#allocation7 + $0x20] sm:$0xff]   ;;  %v944_v16 = vld [vmem:[#allocation7 + $0x28] sm:$0xff]   ;;  %v946_v17 = vld [vmem:[#allocation7 + $0x70] sm:$0xff]   ;;  %s1047_s0 = scalar_lea.vmem %s1046_s28, 512  ;;  %p1048_p1 = scmp.lt.s32.totalorder %s1386_s26, %s1046_s28 }
  0x7f   : > { %829 = vmatmul.mubr.msk.bf16.vlgmr.msra.gmra.mrb[0].mxu0 %vm254_vm1, %v928_v4  ;;  %v947_v18 = vld [vmem:[#allocation7 + $0x30] sm:$0xff]   ;;  %v949_v19 = vld [vmem:[#allocation7 + $0x78] sm:$0xff]   ;;  %v933_v25 = vld [vmem:[#allocation7 + $0x80] sm:$0xff]   ;;  %p1043_p7 = pnand %p1042_p3, %p1243_p12  ;;  %p1049_p5 = scmp.lt.s32.totalorder %s1047_s0, %s1041_s16 }
  0x80   : > { %796 = vmatpush3.bf16.msra.mxu0 %v930_v6  ;;  %v936_v26 = vld [vmem:[#allocation7 + $0x88] sm:$0xff]   ;;  %v939_v27 = vld [vmem:[#allocation7 + $0x90] sm:$0xff]   ;;  %v942_v28 = vld [vmem:[#allocation7 + $0x98] sm:$0xff]  }
  0x81   : > { %797 = vmatprep.subr.bf16.mxu0 %v931_v7  ;;  %v945_v29 = vld [vmem:[#allocation7 + $0xa0] sm:$0xff]   ;;  %v948_v30 = vld [vmem:[#allocation7 + $0xa8] sm:$0xff]   ;;  %v950_v31 = vld [vmem:[#allocation7 + $0x38] sm:$0xff]   ;;  %p1044_p9 = pneg %p1043_p7  ;;  %p1050_p2 = por %p1049_p5, %p1048_p1 }
  0x82   : > { %v951_v32 = vld [vmem:[#allocation7 + $0xb0] sm:$0xff]   ;;  %v952_v33 = vld [vmem:[#allocation7 + $0xb8] sm:$0xff]  }
  0x83   : > { %p1051_p6 = pnand %p1050_p2, %p1044_p9 }
  0x84   : > { %798 = vmatpush3.bf16.msra.mxu0 %v932_v8 }
  0x85   : > { %799 = vmatprep.subr.bf16.mxu0 %v934_v9 }
  0x88   : > { %800 = vmatpush3.bf16.msra.mxu0 %v935_v10 }
  0x89   : > { %801 = vmatprep.subr.bf16.mxu0 %v937_v11 }
  0x8c   : > { %802 = vmatpush3.bf16.msra.mxu0 %v938_v12 }
  0x8d   : > { %803 = vmatprep.subr.bf16.mxu0 %v940_v13 }
  0x90   : > { %804 = vmatpush3.bf16.msra.mxu0 %v941_v14 }
  0x91   : > { %805 = vmatprep.subr.bf16.mxu0 %v943_v15 }
  0x94   : > { %806 = vmatpush3.bf16.msra.mxu0 %v944_v16 }
  0x95   : > { %807 = vmatprep.subr.bf16.mxu0 %v946_v17 }
  0x98   : > { %808 = vmatpush3.bf16.msra.mxu0 %v947_v18 }
  0x99   : > { %809 = vmatprep.subr.bf16.mxu0 %v949_v19 }
  0x9c   : > { %810 = vmatpush3.bf16.msra.mxu0 %v950_v31 }
 0x152   : > { %v292_v20 = vpop.f32.mrb[0].mxu0 }
 0x153   : > { %v830_v21 = vpop.f32.mrb[1].mxu0 }
 0x154   : > { %v295_v22 = vpop.f32.mrb[2].mxu0 }
 0x155   : > { %v299_v23 = vpack.c.bf16 %v295_v22, %v292_v20  ;;  %v831_v24 = vpop.f32.mrb[3].mxu0 }
 0x157   : > { %833 = vmatpush3.bf16.msra.mxu1 %v299_v23  ;;  %570 = vmatprep.mubr.bf16.mxu0 %v299_v23 }
 0x158   : > { %838 = vmatprep.subr.bf16.mxu1 %v1124_v0  ;;  %571 = vmatmul.mubr.bf16.vlgmr.msra.gmra.mrb[4].mxu0 %v1365_v3 }
 0x15a   : > { %835 = vmatmul.mubr.msk.bf16.vlgmr.msra.gmra.mrb[0].mxu1 %vm254_vm1, %v928_v4 }
 0x15b   : > { %839 = vmatpush3.bf16.msra.mxu1 %v933_v25  ;;  %854 = vmatprep.mubr.msk.bf16.mxu1 %vm1125_vm0, %v1124_v0 }
 0x15c   : > { %840 = vmatprep.subr.bf16.mxu1 %v1124_v0 }
 0x15f   : > { %841 = vmatpush3.bf16.msra.mxu1 %v936_v26 }
 0x160   : > { %842 = vmatprep.subr.bf16.mxu1 %v1124_v0 }
 0x163   : > { %843 = vmatpush3.bf16.msra.mxu1 %v939_v27 }
 0x164   : > { %844 = vmatprep.subr.bf16.mxu1 %v1124_v0 }
 0x167   : > { %845 = vmatpush3.bf16.msra.mxu1 %v942_v28 }
 0x168   : > { %846 = vmatprep.subr.bf16.mxu1 %v1124_v0 }
 0x16b   : > { %847 = vmatpush3.bf16.msra.mxu1 %v945_v29 }
 0x16c   : > { %848 = vmatprep.subr.bf16.mxu1 %v1124_v0 }
 0x16f   : > { %849 = vmatpush3.bf16.msra.mxu1 %v948_v30 }
 0x170   : > { %850 = vmatprep.subr.bf16.mxu1 %v1124_v0 }
 0x173   : > { %851 = vmatpush3.bf16.msra.mxu1 %v951_v32 }
 0x174   : > { %852 = vmatprep.subr.bf16.mxu1 %v1124_v0 }
 0x177   : > { %853 = vmatpush3.bf16.msra.mxu1 %v952_v33 }
 0x22b   : > { %v811_v43 = vpop.f32.mrb[4].mxu0 }
 0x22c   : > { %v812_v44 = vpop.f32.mrb[5].mxu0 }
 0x22d   : > { %v334_v34 = vpop.f32.mrb[0].mxu1  ;;  %v813_v45 = vadd.f32 %v812_v44, %v811_v43  ;;  %v814_v46 = vpop.f32.mrb[6].mxu0 }
 0x22e   : > { %v341_v35 = vmul.f32 2.0, %v334_v34  ;;  %v836_v36 = vpop.f32.mrb[1].mxu1  ;;  %v815_v47 = vpop.f32.mrb[7].mxu0 }
 0x22f   : > { %v337_v37 = vpop.f32.mrb[2].mxu1  ;;  %v816_v48 = vadd.f32 %v815_v47, %v814_v46 }
 0x230   : > { %v342_v38 = vmul.f32 2.0, %v337_v37  ;;  %v837_v39 = vpop.f32.mrb[3].mxu1  ;;  %v343_v40 = vsub.f32 %v341_v35, %v1359_v1 }
 0x232   : > { %v344_v41 = vsub.f32 %v342_v38, %v1361_v2 }
 0x234   : > { %v345_v42 = vpack.c.bf16 %v344_v41, %v343_v40 }
 0x236   : > { %855 = vmatmul.mubr.bf16.vlgmr.msra.gmra.mrb[4].mxu1 %v345_v42 }
 0x309   : > { %v613_v49 = vpop.f32.mrb[4].mxu1 }
 0x30a   : > { %v614_v50 = vadd.f32 %v813_v45, %v613_v49  ;;  %v856_v51 = vpop.f32.mrb[5].mxu1 }
 0x30b   : > { %v616_v52 = vpop.f32.mrb[6].mxu1 }
 0x30c   : > { %620 = vst [vmem:[%s242_s18] sm:$0xff] %v614_v50  ;;  %v617_v53 = vadd.f32 %v816_v48, %v616_v52  ;;  %v857_v54 = vpop.f32.mrb[7].mxu1 }
 0x30e   : > { %621 = vst [vmem:[%s242_s18 + $0x8] sm:$0xff] %v617_v53 }
 0x30f   : > { %1054 = shalt.err (!%p1051_p6)
}
 0x310   : > { %s1055_s29 = scalar_lea.hbm %s1391_s10, 256  ;;  %s1059_s4 = scalar_lea.hbm %s1438_s3, 512 }
 0x311   : > { %p1056_p8 = scmp.ne.s32.totalorder %s1391_s10, %s1055_s29  ;;  %p1060_p4 = scmp.lt.u32.totalorder %s1391_s10, %s1438_s3 }
 0x312   : > { %p1061_p11 = scmp.lt.u32.totalorder %s1059_s4, %s1055_s29  ;;  %p1063_p3 = scmp.lt.u32.totalorder %s1055_s29, %s1391_s10 }
 0x313   : > { %p1057_p10 = pnand %p1056_p8, %p1243_p12 }
 0x314   : > { %p1062_p13 = por %p1061_p11, %p1060_p4 }
 0x315   : > { %p1058_p0 = pneg %p1057_p10 }
 0x316   : > { %p1064_p7 = por %p1063_p3, %p1062_p13 }
 0x318   : > { %p1065_p9 = pnand %p1064_p7, %p1058_p0 }
 0x31a   : > { %1068 = shalt.err (!%p1065_p9)
}
 0x31b   : > { %s1127_s9 = smov 128   ;;  %s1128_s22 = smov 8  }
 0x31c   : > { %866 = dma.vmem_to_hbm [thread:$0]  (%p1243_p12), %s1386_s26, 256, %s1391_s10, %s623_s11, %s1127_s9, %s1127_s9, %s1128_s22  }
 0x31d PF: > { %s651_s18 = sand.u32 1, %s1103_s12   ;;  %p1459_p1 = scmp.ne.s32.totalorder %s1446_s19, 0 }
 0x31e   : > { %p1460_p5 = scmp.ge.s32.totalorder %s1115_s15, 2  ;;  %s652_s30 = scalar_lea.sflag [#allocation4], %s651_s18 }
 0x320   : > { %p880_p2 = pnand %p1460_p5, %p1459_p1 }
 0x322   : > { %1098 = dma.done.wait (!%p880_p2), %s652_s30, 256  }
 0x323   : > { %1100 = vsyncadd (!%p880_p2), %s652_s30, 4294967040  ;;  %p19_p6 = scmp.ge.s32.totalorder %s1205_s24, 4   ;;  %s1461_s12 = smov %s1107_s13 }
 0x324   : > { %s1462_s13 = smov %s1111_s14  ;;  %s1463_s14 = smov %s1239_s17 }
 0x325   : > { %s1464_s15 = smov %s1205_s24  ;;  %21 = sbr.rel (!%p19_p6) target bundleno = 9 (0x9), region = 94 }
 0x32c   :  { %657 = vsyncpa [#allocation3], 1 }
 0x32d   :  { %659 = vsyncpa [#allocation3 + $0x1], 1 }
 0x32e   :  { %660 = vsyncpa [#allocation6], 1 }
 0x32f   :  { %662 = vsyncpa [#allocation6 + $0x1], 1 }
 0x330   :  { %663 = vsyncpa [#allocation4], 1 }
 0x331   :  { %665 = vsyncpa [#allocation4 + $0x1], 1 }

</bundles_post_ra>
